<compile_context>
chip_gen: v7x
topology: tpu7x:2x2x1
jax: 0.10.0
libtpu: 0.0.40
codegen_flags: <defaults>
</compile_context>

<pallas_src>
import jax
import jax.numpy as jnp
from jax.experimental import pallas as pl
from jax.experimental.pallas import tpu as pltpu


def _round_up(x, m):
    return ((x + m - 1) // m) * m


def bidaf_output_kernel(h_ref, w_ref, b_ref, o_ref):
    # h_ref: (L, TB, H) batch tile of the RNN final hidden state
    # w_ref: (C, H)     Linear weight, PyTorch layout (VMEM-resident)
    # b_ref: (1, C)     Linear bias (VMEM-resident)
    # o_ref: (TB, C)
    #
    # permute(1,0,2) + sum(dim=1) collapses to a sum over axis 0.
    # Accumulate in f32 without up-casting the whole (L, TB, H) block first.
    summed = jnp.sum(h_ref[...], axis=0, dtype=jnp.float32)          # (TB, H)

    w = w_ref[...]
    if w.dtype != jnp.float32:          # trace-time: no-op cast elided for f32
        w = w.astype(jnp.float32)
    b = b_ref[...]
    if b.dtype != jnp.float32:
        b = b.astype(jnp.float32)

    # (TB, H) contracted with (C, H) over H -> (TB, C); the transpose is folded
    # into the contraction dims instead of materializing weight.T outside.
    logits = jax.lax.dot_general(
        summed, w, (((1,), (1,)), ((), ())),
        preferred_element_type=jnp.float32)                          # (TB, C)

    o_ref[...] = (logits + b).astype(o_ref.dtype)


def bidaf_output(h_n, weight, bias, *, block_b=512):
    """h_n: (L, B, H); weight: (C, H) (nn.Linear layout); bias: (C,).

    Returns logits of shape (B, C) with the same dtype as h_n.
    """
    L, B, H = h_n.shape
    C = weight.shape[0]

    # Batch tile: multiple of 8 sublanes; tiny batches use one block, large
    # batches stream 512-row slabs (near HBM roofline, comfortably inside
    # v7x's 64 MiB VMEM when double-buffered).
    TB = min(_round_up(block_b, 8), _round_up(B, 8))
    grid = (pl.cdiv(B, TB),)          # last block may be partial; Pallas masks it

    b2 = bias.reshape(1, C)

    # Explicit VMEM budget with lane-padded tile sizes: double-buffered h tile
    # + double-buffered out tile + resident weight/bias, with 2x headroom;
    # clamped to [8 MiB, 64 MiB] (v7x physical cap).
    h_item = jnp.dtype(h_n.dtype).itemsize
    wb_item = jnp.dtype(weight.dtype).itemsize
    H_pad = _round_up(H, 128)
    C_pad = _round_up(C, 128)
    vmem_needed = (2 * L * TB * H_pad * h_item
                   + 2 * TB * C_pad * h_item
                   + (_round_up(C, 8) * H_pad + C_pad) * wb_item)
    vmem_limit = int(min(max(2 * vmem_needed, 8 << 20), 64 << 20))

    return pl.pallas_call(
        bidaf_output_kernel,
        out_shape=jax.ShapeDtypeStruct((B, C), h_n.dtype),
        grid=grid,
        in_specs=[
            pl.BlockSpec((L, TB, H), lambda i: (0, i, 0)),   # streamed per tile
            pl.BlockSpec((C, H), lambda i: (0, 0)),          # loaded once
            pl.BlockSpec((1, C), lambda i: (0, 0)),          # loaded once
        ],
        out_specs=pl.BlockSpec((TB, C), lambda i: (i, 0)),
        compiler_params=pltpu.CompilerParams(
            dimension_semantics=("parallel",),   # shard batch tiles across TCs on v7x
            vmem_limit_bytes=vmem_limit,
        ),
    )(h_n, weight, b2)


if __name__ == "__main__":
    # Small, deterministic example consistent with the module:
    # h_n is an RNN hidden state of shape (num_layers*directions, batch, hidden)
    L, B, H, C = 2, 8, 32, 4

    key = jax.random.PRNGKey(0)
    k_h, k_w, k_b = jax.random.split(key, 3)

    h_n = jax.random.normal(k_h, (L, B, H), dtype=jnp.float32)

    # nn.Linear(hidden_size, num_cls) default init: U(-1/sqrt(H), 1/sqrt(H))
    bound = 1.0 / (H ** 0.5)
    weight = jax.random.uniform(k_w, (C, H), minval=-bound, maxval=bound,
                                dtype=jnp.float32)
    bias = jax.random.uniform(k_b, (C,), minval=-bound, maxval=bound,
                              dtype=jnp.float32)

    # Reference in plain JAX (same math as the PyTorch forward).
    def ref_fn(h, w, b):
        return jnp.sum(jnp.transpose(h, (1, 0, 2)), axis=1) @ w.T + b

    # 1) Toy shape: single grid step.
    logits = bidaf_output(h_n, weight, bias)
    jax.block_until_ready(logits)
    assert logits.shape == (B, C)
    assert jnp.allclose(logits, ref_fn(h_n, weight, bias), atol=1e-5, rtol=1e-5)

    # 2) Multi-tile path with a partial last block: B=72, TB=32 -> grid=(3,)
    #    with the last block covering only 8 valid rows (exercises masking).
    B2 = 72
    h_n2 = jax.random.normal(jax.random.PRNGKey(1), (L, B2, H), dtype=jnp.float32)
    logits2 = bidaf_output(h_n2, weight, bias, block_b=32)
    jax.block_until_ready(logits2)
    assert logits2.shape == (B2, C)
    assert jnp.allclose(logits2, ref_fn(h_n2, weight, bias), atol=1e-5, rtol=1e-5)

    print("KERNEL_OK")
</pallas_src>

<mosaic_0001>
module attributes {stable_mosaic.version = 11 : i64} {
  func.func @bidaf_output_kernel(%arg0: i32, %arg1: memref<2x8x32xf32, #tpu.memory_space<vmem>>, %arg2: memref<4x32xf32, #tpu.memory_space<vmem>>, %arg3: memref<1x4xf32, #tpu.memory_space<vmem>>, %arg4: memref<8x4xf32, #tpu.memory_space<vmem>>) attributes {dimension_semantics = [#tpu.dimension_semantics<parallel>], iteration_bounds = array<i64: 1>, scalar_prefetch = 0 : i64, scratch_operands = 0 : i64, tpu.core_type = #tpu.core_type<tc>, window_params = [{transform_indices = @transform_0, window_bounds = array<i64: 2, 8, 32>}, {pipeline_mode = #tpu.pipeline_mode<synchronous>, transform_indices = @transform_1, window_bounds = array<i64: 4, 32>}, {pipeline_mode = #tpu.pipeline_mode<synchronous>, transform_indices = @transform_2, window_bounds = array<i64: 1, 4>}, {transform_indices = @transform_3, window_bounds = array<i64: 8, 4>}]} {
    %c0 = arith.constant 0 : index
    %c0_0 = arith.constant 0 : index
    %c0_1 = arith.constant 0 : index
    %0 = vector.load %arg1[%c0, %c0_0, %c0_1] : memref<2x8x32xf32, #tpu.memory_space<vmem>>, vector<2x8x32xf32>
    %cst = arith.constant dense<0.000000e+00> : vector<8x32xf32>
    %1 = vector.multi_reduction <add>, %0, %cst [0] : vector<2x8x32xf32> to vector<8x32xf32>
    %c0_2 = arith.constant 0 : index
    %c0_3 = arith.constant 0 : index
    %2 = vector.load %arg2[%c0_2, %c0_3] : memref<4x32xf32, #tpu.memory_space<vmem>>, vector<4x32xf32>
    %c0_4 = arith.constant 0 : index
    %c0_5 = arith.constant 0 : index
    %3 = vector.load %arg3[%c0_4, %c0_5] : memref<1x4xf32, #tpu.memory_space<vmem>>, vector<1x4xf32>
    %cst_6 = arith.constant dense<0.000000e+00> : vector<8x4xf32>
    %4 = tpu.matmul %1, %2, %cst_6 {dimension_numbers = #tpu.dot_dimension_numbers<[1], [1], [0], [0], [0, 0, 1, 0], [], []>} : vector<8x32xf32>, vector<4x32xf32>, vector<8x4xf32> -> vector<8x4xf32>
    %5 = vector.broadcast %3 : vector<1x4xf32> to vector<8x4xf32>
    %6 = arith.addf %4, %5 : vector<8x4xf32>
    %c0_7 = arith.constant 0 : index
    %c0_8 = arith.constant 0 : index
    %7 = vector.load %arg4[%c0_7, %c0_8] : memref<8x4xf32, #tpu.memory_space<vmem>>, vector<8x4xf32>
    tpu.vector_store %arg4[%c0_7, %c0_8], %6 {strides = array<i32>} : memref<8x4xf32, #tpu.memory_space<vmem>>, vector<8x4xf32>,
    return
  }
  func.func @transform_0(%arg0: i32) -> (i32, i32, i32) {
    %c0_i32 = arith.constant 0 : i32
    %c0_i32_0 = arith.constant 0 : i32
    %c0_i32_1 = arith.constant 0 : i32
    return %c0_i32, %arg0, %c0_i32_0 : i32, i32, i32
  }
  func.func @transform_1(%arg0: i32) -> (i32, i32) {
    %c0_i32 = arith.constant 0 : i32
    %c0_i32_0 = arith.constant 0 : i32
    %c0_i32_1 = arith.constant 0 : i32
    return %c0_i32, %c0_i32_0 : i32, i32
  }
  func.func @transform_2(%arg0: i32) -> (i32, i32) {
    %c0_i32 = arith.constant 0 : i32
    %c0_i32_0 = arith.constant 0 : i32
    %c0_i32_1 = arith.constant 0 : i32
    return %c0_i32, %c0_i32_0 : i32, i32
  }
  func.func @transform_3(%arg0: i32) -> (i32, i32) {
    %c0_i32 = arith.constant 0 : i32
    %c0_i32_0 = arith.constant 0 : i32
    return %arg0, %c0_i32 : i32, i32
  }
}

</mosaic_0001>

<bundles_post_ra>
// kernel: tpu_custom_call.1
= control target key start
LH: loop header
LB: loop body
LE: loop exit
PB: predicated region body
PF: predicated region fallthrough
CT: control target
= control target key end

     0   :  { %8 = vsyncpa [#allocation3], 0  ;;  %s258_s0 = inlined_call_operand.hbm [shape: f32[2,8,32], index: 0, kind: input, shape index: {}]   ;;  %s259_s1 = inlined_call_operand.hbm [shape: f32[4,32], index: 1, kind: input, shape index: {}]   ;;  %s260_s2 = inlined_call_operand.vmem [shape: f32[1,4], index: 2, kind: input, shape index: {}]   ;;  %s261_s3 = inlined_call_operand.vmem [shape: f32[8,4], index: 3, kind: output, shape index: {}]  }
   0x1   :  { %9 = vsyncpa [#allocation5], 0  ;;  %s202_s12 = smov [#allocation2]   ;;  %s154_s16 = scalar_lea.hbm %s258_s0, 256 }
   0x2   :  { %s15_s13 = sshll.u32 %s202_s12, 4  ;;  %p155_p0 = scmp.ne.s32.totalorder %s258_s0, %s154_s16  ;;  %s16_s13 = int_to_ptr.vmem [resolvable:$true] %s15_s13 }
   0x3   :  { %p158_p1 = scmp.lt.u32.totalorder %s154_s16, %s258_s0 }
   0x5   :  { %p160_p2 = pnand %p158_p1, %p155_p0 }
   0x7   :  { %163 = shalt.err (!%p160_p2)
}
   0x8   :  { %s164_s21 = scalar_lea.vmem %s16_s13, 256  ;;  %p169_p4 = scmp.lt.s32.totalorder %s16_s13, %s16_s13 }
   0x9   :  { %p165_p3 = scmp.ne.s32.totalorder %s16_s13, %s164_s21  ;;  %p170_p5 = scmp.lt.s32.totalorder %s164_s21, %s164_s21 }
   0xb   :  { %p171_p6 = por %p170_p5, %p169_p4 }
   0xd   :  { %p172_p7 = pnand %p171_p6, %p165_p3 }
   0xf   :  { %175 = shalt.err (!%p172_p7)
}
  0x10   :  { %s203_s22 = smov 128   ;;  %s204_s23 = smov 8  }
  0x11   :  { %21 = dma.hbm_to_vmem [thread:$0]  %s258_s0, 256, %s16_s13, [#allocation3], %s203_s22, %s203_s22, %s204_s23  }
  0x12   :  { %s205_s26 = smov [#allocation4]   ;;  %s176_s30 = scalar_lea.hbm %s259_s1, 64 }
  0x13   :  { %s28_s27 = sshll.u32 %s205_s26, 4  ;;  %p177_p8 = scmp.ne.s32.totalorder %s259_s1, %s176_s30  ;;  %s29_s27 = int_to_ptr.vmem [resolvable:$true] %s28_s27 }
  0x14   :  { %p180_p9 = scmp.lt.u32.totalorder %s176_s30, %s259_s1 }
  0x16   :  { %p182_p10 = pnand %p180_p9, %p177_p8 }
  0x18   :  { %185 = shalt.err (!%p182_p10)
}
  0x19   :  { %s186_s8 = scalar_lea.vmem %s29_s27, 64  ;;  %p191_p12 = scmp.lt.s32.totalorder %s29_s27, %s29_s27 }
  0x1a   :  { %p187_p11 = scmp.ne.s32.totalorder %s29_s27, %s186_s8  ;;  %p192_p13 = scmp.lt.s32.totalorder %s186_s8, %s186_s8 }
  0x1c   :  { %p193_p0 = por %p192_p13, %p191_p12 }
  0x1e   :  { %p194_p1 = pnand %p193_p0, %p187_p11 }
  0x20   :  { %197 = shalt.err (!%p194_p1)
}
  0x21   :  { %31 = dma.hbm_to_vmem [thread:$0]  %s259_s1, 64, %s29_s27, [#allocation5]  }
  0x22   :  { %198 = dma.done.wait [#allocation3], 256  }
  0x23   :  { %199 = vsyncadd [#allocation3], 4294967040 }
  0x24   :  { %200 = dma.done.wait [#allocation5], 64  }
  0x25   :  { %201 = vsyncadd [#allocation5], 4294967232  ;;  %v206_v0 = vmov 0.0   ;;  %vm207_vm0 = vmmov 0   ;;  %vm42_vm1 = vcmask 261120   ;;  %v40_v1 = vld [vmem:[#allocation2] sm:$0xff] }
  0x26   :  { %143 = vmatprep.subr.mxu0 %v206_v0  ;;  %145 = vmatprep.mubr.msk.f32.mxu0 %vm207_vm0, %v206_v0  ;;  %v41_v2 = vld [vmem:[#allocation2 + $0x8] sm:$0xff]  ;;  %v46_v3 = vld [vmem:[#allocation4] sm:$0xf]  ;;  %v43_v4 = vsel %vm42_vm1, %v40_v1, 0.0  ;;  %v138_v7 = vld [vmem:[%s260_s2] ss:$0 sm:$0xff] }
  0x27   :  { %v44_v5 = vsel %vm42_vm1, %v41_v2, 0.0  ;;  %144 = vmatpush3.xpose.msk.msra.mxu0 %vm42_vm1, %v46_v3  ;;  %vm130_vm2 = vcmask 31744  }
  0x28   :  { %v45_v6 = vadd.f32 %v44_v5, %v43_v4 }
  0x2a   :  { %146 = vmatmul.mubr.msk.f32.vlgmr.msra.gmra.mrb[0].mxu0 %vm42_vm1, %v45_v6 }
  0xfd   :  { %v126_v8 = vpop.f32.mrb[0].mxu0 }
  0xfe   :  { %v127_v9 = vadd.f32 %v138_v7, %v126_v8  ;;  %v147_v10 = vpop.f32.mrb[1].mxu0 }
 0x100   :  { %131 = vst.msk [vmem:[%s261_s3] sm:$0xff] %vm130_vm2, %v127_v9 }
 0x101   :  { %136 = vsyncpa [#allocation3], 1 }
 0x102   :  { %137 = vsyncpa [#allocation5], 1 }

</bundles_post_ra>
